<compile_context>
chip_gen: v6e
topology: v6e:2x2x1
jax: 0.10.0
libtpu: 0.0.40
codegen_flags: <defaults>
</compile_context>

<pallas_src>
import functools

import jax
import jax.numpy as jnp
from jax.experimental import pallas as pl
from jax.experimental.pallas import tpu as pltpu


def _rmsnorm_kernel(x_ref, w_ref, o_ref, *, eps, cast_to_weight_dtype):
    # x_ref: (row_tile, hidden), w_ref: (1, hidden), o_ref: (row_tile, hidden)
    # Pass 1: per-row mean-of-squares in f32 (lane reduction), rsqrt on EUP.
    xf = x_ref[...].astype(jnp.float32)
    variance = jnp.mean(xf * xf, axis=-1, keepdims=True)      # (row_tile, 1) f32
    inv = jax.lax.rsqrt(variance + eps)
    # Pass 2: re-read + re-cast x so a full-tile f32 copy does not have to stay
    # live across the reduction (keeps VMEM pressure near one f32 tile).
    normed = x_ref[...].astype(jnp.float32) * inv
    w = w_ref[...]
    if cast_to_weight_dtype:
        # HF parity: cast normalized activations to the half-precision weight
        # dtype BEFORE the weight multiply.
        normed = normed.astype(w.dtype)
    o_ref[...] = (w * normed).astype(o_ref.dtype)


def _sublane_pack(dtype):
    # rows per packed vreg sublane group for this dtype
    return {1: 32, 2: 16, 4: 8}.get(jnp.dtype(dtype).itemsize, 8)


def _vmem_capacity_bytes():
    """Per-core VMEM capacity; conservative fallback is v7x's 64 MiB."""
    try:
        cap = getattr(pltpu.get_tpu_info(), "vmem_capacity_bytes", None)
        if cap:
            return int(cap)
    except Exception:
        pass
    return 64 * 1024 * 1024


def _pick_row_tile(rows, hidden, in_dtype, out_dtype, vmem_budget_bytes):
    """Largest pack-aligned row tile whose per-step VMEM footprint fits the budget."""
    pack = _sublane_pack(in_dtype)
    in_b = jnp.dtype(in_dtype).itemsize
    out_b = jnp.dtype(out_dtype).itemsize
    # Per-row VMEM cost of one grid step: double-buffered in+out blocks plus
    # one full-tile f32 working copy (cast / normalize intermediate).
    per_row = hidden * (2 * (in_b + out_b) + 4)
    tile = max(pack, int(vmem_budget_bytes // per_row))
    tile = min(tile, 2048)
    # Pipelining: target >= 8 grid steps (>= 4 per TensorCore on v7x) so the
    # double-buffered pipeline reaches steady state on both cores, but never
    # shrink the input block below ~2 MiB (per-step overhead ~0.35 us).
    floor_rows = max(pack, -(-(2 * 1024 * 1024) // (hidden * in_b)))
    depth_rows = max(pl.cdiv(rows, 8), floor_rows)
    tile = min(tile, depth_rows)
    if rows <= tile:
        return rows                                # single step; full-extent block is legal
    return max(pack, (tile // pack) * pack)        # pack-aligned: full vregs, unmasked stores


def llama_rmsnorm(hidden_states, weight, attention_mask=None, position_ids=None,
                  eps=1e-6, row_tile=None, vmem_budget_bytes=None):
    """Forward pass of LlamaRMSNorm. attention_mask / position_ids are accepted
    for signature parity with the PyTorch module but unused, as in the spec.

    If passing an explicit `row_tile`, keep it a multiple of 8 (sublane pack)
    unless it equals the full row count.
    """
    orig_shape = hidden_states.shape
    hidden = orig_shape[-1]
    x2d = hidden_states.reshape(-1, hidden)
    rows = x2d.shape[0]

    w_dtype = jnp.dtype(weight.dtype)
    cast_to_weight_dtype = w_dtype in (jnp.dtype(jnp.float16), jnp.dtype(jnp.bfloat16))
    if cast_to_weight_dtype:
        out_dtype = w_dtype
    else:
        # torch: (x * rsqrt) promotes to f32, then f32 weight * f32 -> f32
        out_dtype = jnp.promote_types(jnp.float32, w_dtype)

    capacity = _vmem_capacity_bytes()
    if vmem_budget_bytes is None:
        vmem_budget_bytes = min(32 * 1024 * 1024, capacity // 3)
    if row_tile is None:
        row_tile = _pick_row_tile(rows, hidden, x2d.dtype, out_dtype, vmem_budget_bytes)

    w2d = weight.reshape(1, hidden)
    # Ragged final block is handled by Pallas: padded-region reads feed only
    # discarded rows (per-row independence) and out-of-bounds writes are masked.
    grid = (pl.cdiv(rows, row_tile),)

    # Scoped-VMEM limit: double-buffered in/out blocks + one f32 working copy
    # + resident weight (sublane-padded, double-buffered), with headroom,
    # capped generation-aware below physical VMEM (64 MiB on v7x).
    in_b = jnp.dtype(x2d.dtype).itemsize
    out_b = jnp.dtype(out_dtype).itemsize
    need = (2 * row_tile * hidden * (in_b + out_b)
            + row_tile * hidden * 4
            + 2 * 8 * hidden * w_dtype.itemsize)
    vmem_limit = int(1.4 * need) + (1 << 20)
    vmem_limit = max(vmem_limit, 16 * 1024 * 1024)
    vmem_limit = min(vmem_limit, int(0.78 * capacity))

    # NOTE: the weight BlockSpec has a constant index_map, so Mosaic keeps the
    # (tiny) block resident across grid steps; an explicit pl.Buffered(1) is
    # not needed for correctness and saves only sublane-padded bytes.
    kernel = functools.partial(_rmsnorm_kernel, eps=eps,
                               cast_to_weight_dtype=cast_to_weight_dtype)

    out = pl.pallas_call(
        kernel,
        out_shape=jax.ShapeDtypeStruct((rows, hidden), out_dtype),
        grid_spec=pl.GridSpec(
            grid=grid,
            in_specs=[
                pl.BlockSpec((row_tile, hidden), lambda i: (i, 0)),
                pl.BlockSpec((1, hidden), lambda i: (0, 0)),   # weight stays resident
            ],
            out_specs=pl.BlockSpec((row_tile, hidden), lambda i: (i, 0)),
        ),
        compiler_params=pltpu.CompilerParams(
            dimension_semantics=("parallel",),
            vmem_limit_bytes=vmem_limit,
        ),
    )(x2d, w2d)

    return out.reshape(orig_shape)


def _reference(x, weight, eps=1e-6):
    xf = x.astype(jnp.float32)
    var = jnp.mean(xf * xf, axis=-1, keepdims=True)
    normed = xf * jax.lax.rsqrt(var + eps)
    if jnp.dtype(weight.dtype) in (jnp.dtype(jnp.float16), jnp.dtype(jnp.bfloat16)):
        normed = normed.astype(weight.dtype)
    return weight * normed


if __name__ == "__main__":
    key = jax.random.PRNGKey(0)
    batch, seq, hidden = 2, 8, 256
    x = jax.random.normal(key, (batch, seq, hidden), dtype=jnp.float32)

    # Deterministic parameter init, same as nn.Parameter(torch.ones(hidden_size)).
    weight = jnp.ones((hidden,), dtype=jnp.float32)

    attention_mask = jnp.ones((batch, seq), dtype=jnp.float32)                      # unused
    position_ids = jnp.arange(seq, dtype=jnp.int32)[None, :].repeat(batch, 0)       # unused

    out = llama_rmsnorm(x, weight, attention_mask, position_ids)
    out = jax.block_until_ready(out)
    ref = _reference(x, weight)
    assert out.shape == x.shape
    assert out.dtype == ref.dtype
    assert jnp.allclose(out, ref, atol=1e-5, rtol=1e-5)

    # Ragged rows, single-step path (block equals full array extent).
    x_rag = jax.random.normal(jax.random.PRNGKey(1), (3, 7, hidden), dtype=jnp.float32)
    out_rag = jax.block_until_ready(llama_rmsnorm(x_rag, weight))
    assert jnp.allclose(out_rag, _reference(x_rag, weight), atol=1e-5, rtol=1e-5)

    # Ragged rows with multi-step grid: final block is partial and masked by
    # Pallas (no host-side padding / slicing).
    hidden2 = 128
    w2 = jnp.ones((hidden2,), dtype=jnp.float32)
    x_msk = jax.random.normal(jax.random.PRNGKey(2), (5, 8, hidden2), dtype=jnp.float32)
    out_msk = jax.block_until_ready(llama_rmsnorm(x_msk, w2, row_tile=16))
    assert jnp.allclose(out_msk, _reference(x_msk, w2), atol=1e-5, rtol=1e-5)

    # Half-precision weight path (HF cast-before-weight-multiply semantics).
    x_bf = x.astype(jnp.bfloat16)
    w_bf = jnp.ones((hidden,), dtype=jnp.bfloat16)
    out_bf = jax.block_until_ready(llama_rmsnorm(x_bf, w_bf))
    ref_bf = _reference(x_bf, w_bf)
    assert out_bf.dtype == jnp.bfloat16
    assert jnp.allclose(out_bf.astype(jnp.float32), ref_bf.astype(jnp.float32),
                        atol=1e-2, rtol=1e-2)

    print("KERNEL_OK")
</pallas_src>

<mosaic_0001>
module attributes {stable_mosaic.version = 11 : i64} {
  func.func @_rmsnorm_kernel(%arg0: i32, %arg1: memref<16x256xf32, #tpu.memory_space<vmem>>, %arg2: memref<1x256xf32, #tpu.memory_space<vmem>>, %arg3: memref<16x256xf32, #tpu.memory_space<vmem>>) attributes {dimension_semantics = [#tpu.dimension_semantics<parallel>], iteration_bounds = array<i64: 1>, scalar_prefetch = 0 : i64, scratch_operands = 0 : i64, tpu.core_type = #tpu.core_type<tc>, window_params = [{transform_indices = @transform_0, window_bounds = array<i64: 16, 256>}, {pipeline_mode = #tpu.pipeline_mode<synchronous>, transform_indices = @transform_1, window_bounds = array<i64: 1, 256>}, {transform_indices = @transform_2, window_bounds = array<i64: 16, 256>}]} {
    %c0 = arith.constant 0 : index
    %c0_0 = arith.constant 0 : index
    %0 = vector.load %arg1[%c0, %c0_0] : memref<16x256xf32, #tpu.memory_space<vmem>>, vector<16x256xf32>
    %1 = arith.mulf %0, %0 : vector<16x256xf32>
    %cst = arith.constant dense<0.000000e+00> : vector<16xf32>
    %2 = vector.multi_reduction <add>, %1, %cst [1] : vector<16x256xf32> to vector<16xf32>
    %3 = vector.shape_cast %2 : vector<16xf32> to vector<16x1xf32>
    %cst_1 = arith.constant 2.560000e+02 : f32
    %4 = vector.broadcast %cst_1 : f32 to vector<16x1xf32>
    %5 = arith.divf %3, %4 : vector<16x1xf32>
    %cst_2 = arith.constant 9.99999997E-7 : f32
    %6 = vector.broadcast %cst_2 : f32 to vector<16x1xf32>
    %7 = arith.addf %5, %6 : vector<16x1xf32>
    %8 = math.rsqrt %7 : vector<16x1xf32>
    %c0_3 = arith.constant 0 : index
    %c0_4 = arith.constant 0 : index
    %9 = vector.load %arg1[%c0_3, %c0_4] : memref<16x256xf32, #tpu.memory_space<vmem>>, vector<16x256xf32>
    %10 = vector.broadcast %8 : vector<16x1xf32> to vector<16x256xf32>
    %11 = arith.mulf %9, %10 : vector<16x256xf32>
    %c0_5 = arith.constant 0 : index
    %c0_6 = arith.constant 0 : index
    %12 = vector.load %arg2[%c0_5, %c0_6] : memref<1x256xf32, #tpu.memory_space<vmem>>, vector<1x256xf32>
    %13 = vector.broadcast %12 : vector<1x256xf32> to vector<16x256xf32>
    %14 = arith.mulf %13, %11 : vector<16x256xf32>
    %c0_7 = arith.constant 0 : index
    %c0_8 = arith.constant 0 : index
    %15 = vector.load %arg3[%c0_7, %c0_8] : memref<16x256xf32, #tpu.memory_space<vmem>>, vector<16x256xf32>
    tpu.vector_store %arg3[%c0_7, %c0_8], %14 {strides = array<i32>} : memref<16x256xf32, #tpu.memory_space<vmem>>, vector<16x256xf32>,
    return
  }
  func.func @transform_0(%arg0: i32) -> (i32, i32) {
    %c0_i32 = arith.constant 0 : i32
    %c0_i32_0 = arith.constant 0 : i32
    return %arg0, %c0_i32 : i32, i32
  }
  func.func @transform_1(%arg0: i32) -> (i32, i32) {
    %c0_i32 = arith.constant 0 : i32
    %c0_i32_0 = arith.constant 0 : i32
    %c0_i32_1 = arith.constant 0 : i32
    return %c0_i32, %c0_i32_0 : i32, i32
  }
  func.func @transform_2(%arg0: i32) -> (i32, i32) {
    %c0_i32 = arith.constant 0 : i32
    %c0_i32_0 = arith.constant 0 : i32
    return %arg0, %c0_i32 : i32, i32
  }
}

</mosaic_0001>

<bundles_post_ra>
// kernel: tpu_custom_call.1
= control target key start
LH: loop header
LB: loop body
LE: loop exit
PB: predicated region body
PF: predicated region fallthrough
CT: control target
= control target key end

     0   :  { %7 = vsyncpa [#allocation3], 0  ;;  %s211_s0 = inlined_call_operand.hbm [shape: f32[16,256], index: 0, kind: input, shape index: {}]   ;;  %s212_s1 = inlined_call_operand.hbm [shape: f32[1,256], index: 1, kind: input, shape index: {}]   ;;  %s213_s2 = inlined_call_operand.hbm [shape: f32[16,256], index: 2, kind: output, shape index: {}]  }
   0x1   :  { %8 = vsyncpa [#allocation6], 0 }
   0x2   :  { %9 = vsyncpa [#allocation4], 0  ;;  %s176_s9 = smov [#allocation2]  }
   0x3   :  { %s15_s10 = sshll.u32 %s176_s9, 4  ;;  %s16_s10 = int_to_ptr.vmem [resolvable:$true] %s15_s10 }
   0x4   :  { %s118_s11 = scalar_lea.vmem %s16_s10, 512  ;;  %p123_p1 = scmp.lt.s32.totalorder %s16_s10, %s16_s10 }
   0x5   :  { %p119_p0 = scmp.ne.s32.totalorder %s16_s10, %s118_s11  ;;  %p124_p2 = scmp.lt.s32.totalorder %s118_s11, %s118_s11 }
   0x7   :  { %p125_p3 = por %p124_p2, %p123_p1 }
   0x9   :  { %p126_p4 = pnand %p125_p3, %p119_p0 }
   0xb   :  { %129 = shalt.err (!%p126_p4)
}
   0xc   :  { %s177_s12 = smov 256   ;;  %s178_s13 = smov 16  }
   0xd   :  { %21 = dma.hbm_to_vmem [thread:$0]  %s211_s0, 512, %s16_s10, [#allocation3], %s177_s12, %s177_s12, %s178_s13  }
   0xe   :  { %s179_s16 = smov [#allocation5]  }
   0xf   :  { %s28_s17 = sshll.u32 %s179_s16, 4  ;;  %s29_s17 = int_to_ptr.vmem [resolvable:$true] %s28_s17 }
  0x10   :  { %s138_s18 = scalar_lea.vmem %s29_s17, 32  ;;  %p143_p6 = scmp.lt.s32.totalorder %s29_s17, %s29_s17 }
  0x11   :  { %p139_p5 = scmp.ne.s32.totalorder %s29_s17, %s138_s18  ;;  %p144_p7 = scmp.lt.s32.totalorder %s138_s18, %s138_s18 }
  0x13   :  { %p145_p8 = por %p144_p7, %p143_p6 }
  0x15   :  { %p146_p9 = pnand %p145_p8, %p139_p5 }
  0x17   :  { %149 = shalt.err (!%p146_p9)
}
  0x18   :  { %31 = dma.hbm_to_vmem [thread:$0]  %s212_s1, 32, %s29_s17, [#allocation6]  }
  0x19   :  { %170 = dma.done.wait [#allocation3], 512  }
  0x1a   :  { %171 = vsyncadd [#allocation3], 4294966784 }
  0x1b   :  { %172 = dma.done.wait [#allocation6], 32  }
  0x1c   :  { %173 = vsyncadd [#allocation6], 4294967264  ;;  %v38_v0 = vld [vmem:[#allocation2] sm:$0xff]  ;;  %v39_v1 = vld [vmem:[#allocation2 + $0x8] sm:$0xff]  ;;  %v65_v15 = vlaneseq  ;;  %s180_s0 = smov [#allocation7]  }
  0x1d   :  { %v40_v2 = vld [vmem:[#allocation2 + $0x10] sm:$0xff]  ;;  %v42_v3 = vmul.f32 %v38_v0, %v38_v0  ;;  %v43_v4 = vmul.f32 %v39_v1, %v39_v1  ;;  %v41_v5 = vld [vmem:[#allocation2 + $0x18] sm:$0xff]  ;;  %v63_v20 = vld [vmem:[#allocation5] sm:$0x3]  ;;  %s88_s1 = sshll.u32 %s180_s0, 4  ;;  %s89_s1 = int_to_ptr.vmem [resolvable:$true] %s88_s1 }
  0x1e   :  { %v44_v6 = vmul.f32 %v40_v2, %v40_v2  ;;  %v45_v7 = vmul.f32 %v41_v5, %v41_v5  ;;  %v66_v17 = vshrl.u32 %v65_v15, 7  ;;  %s150_s21 = scalar_lea.vmem %s89_s1, 512  ;;  %p155_p11 = scmp.lt.s32.totalorder %s89_s1, %s89_s1 }
  0x1f   :  { %v46_v8 = vadd.f32 %v43_v4, %v42_v3  ;;  %p151_p10 = scmp.ne.s32.totalorder %s89_s1, %s150_s21  ;;  %p156_p12 = scmp.lt.s32.totalorder %s150_s21, %s150_s21 }
  0x20   :  { %v49_v9 = vadd.f32 %v45_v7, %v44_v6  ;;  %v67_v18 = vsub.s32 0, %v66_v17  ;;  %v71_v19 = vsub.s32 1, %v66_v17 }
  0x21   :  { %47 = vadd.xlane.f32.xlu0 %v46_v8  ;;  %p157_p13 = por %p156_p12, %p155_p11 }
  0x22   :  { %v68_v21 = vrot.slane %v63_v20, %v67_v18  ;;  %v72_v22 = vrot.slane %v63_v20, %v71_v19 }
  0x23   :  { %p158_p0 = pnand %p157_p13, %p151_p10 }
  0x25   :  { %50 = vadd.xlane.f32.xlu0 %v49_v9 }
  0xaa   :  { %v48_v10 = vpop.xlane.xlu0 %47 }
  0xab   :  { %v53_v11 = vmul.f32 0.00390625, %v48_v10 }
  0xad   :  { %v55_v12 = vadd.f32 1e-06, %v53_v11 }
  0xae   :  { %v51_v13 = vpop.xlane.xlu0 %50 }
  0xaf   :  { %106 = vrsqrt.f32 %v55_v12  ;;  %v54_v14 = vmul.f32 0.00390625, %v51_v13 }
  0xb1   :  { %v56_v16 = vadd.f32 1e-06, %v54_v14 }
  0xb3   :  { %108 = vrsqrt.f32 %v56_v16 }
  0xbc   :  { %v107_v23 = vpop.eup %106 }
  0xbd   :  { %v59_v24 = vmul.f32 %v107_v23, %v38_v0  ;;  %v60_v25 = vmul.f32 %v107_v23, %v39_v1 }
  0xbf   :  { %v75_v26 = vmul.f32 %v68_v21, %v59_v24  ;;  %v76_v27 = vmul.f32 %v72_v22, %v60_v25 }
  0xc0   :  { %v109_v28 = vpop.eup %108 }
  0xc1   :  { %v61_v29 = vmul.f32 %v109_v28, %v40_v2  ;;  %v62_v30 = vmul.f32 %v109_v28, %v41_v5  ;;  %79 = vst [vmem:[#allocation7] sm:$0xff] %v75_v26  ;;  %80 = vst [vmem:[#allocation7 + $0x8] sm:$0xff] %v76_v27 }
  0xc3   :  { %v77_v31 = vmul.f32 %v68_v21, %v61_v29  ;;  %v78_v32 = vmul.f32 %v72_v22, %v62_v30 }
  0xc5   :  { %81 = vst [vmem:[#allocation7 + $0x10] sm:$0xff] %v77_v31  ;;  %82 = vst [vmem:[#allocation7 + $0x18] sm:$0xff] %v78_v32 }
  0xc6   :  { %161 = shalt.err (!%p158_p0)
}
  0xc7   :  { %94 = dma.vmem_to_hbm [thread:$0]  %s89_s1, 512, %s213_s2, [#allocation4], %s177_s12, %s177_s12, %s178_s13  }
  0xc8   :  { %174 = dma.done.wait [#allocation4], 512  }
  0xc9   :  { %175 = vsyncadd [#allocation4], 4294966784 }
  0xca   :  { %98 = vsyncpa [#allocation3], 1 }
  0xcb   :  { %99 = vsyncpa [#allocation6], 1 }
  0xcc   :  { %100 = vsyncpa [#allocation4], 1 }

</bundles_post_ra>
